<compile_context>
chip_gen: v7x
topology: tpu7x:2x2x1
jax: 0.10.0
libtpu: 0.0.40
codegen_flags: <defaults>
</compile_context>

<pallas_src>
import functools

import numpy as np
import jax
import jax.numpy as jnp
from jax import lax
from jax.experimental import pallas as pl
from jax.experimental.pallas import tpu as pltpu


def _round_up(x, m):
    return ((x + m - 1) // m) * m


def _cnn_kernel(x_ref, wband_ref, bias_ref, o_ref, *,
                l_conv, l_pooled, pool_size, pool_stride,
                num_filters, out_w_pad):
    """One row-tile: banded MXU matmul (= conv, all filters) + max-pool + flatten."""
    tile_s = x_ref.shape[0]
    x = x_ref[...].astype(jnp.float32)

    # Conv1d for ALL filters at once on the MXU; output is already laid out
    # channels-major: column f*l_conv + j  ==  conv[f, j].
    conv = jnp.dot(x, wband_ref[...],
                   preferred_element_type=jnp.float32,
                   precision=lax.Precision.HIGHEST)        # (tile_s, w_cols_pad)

    outs = []
    for f in range(num_filters):                           # static, F small
        base = f * l_conv
        seg = conv[:, base:base + l_conv]
        if pool_stride == 1:
            # MaxPool1d via unit-stride lane windows; init from first element.
            pooled = seg[:, 0:l_pooled]
            for p in range(1, pool_size):
                pooled = jnp.maximum(pooled, seg[:, p:p + l_pooled])
        else:
            # TODO(synk): pool_stride > 1 path uses strided lane slices and is
            # not exercised by the defaults; validate layout/cost before use.
            span = pool_stride * (l_pooled - 1) + 1
            pooled = lax.slice(seg, (0, 0), (tile_s, span), (1, pool_stride))
            for p in range(1, pool_size):
                pooled = jnp.maximum(
                    pooled,
                    lax.slice(seg, (0, p), (tile_s, p + span), (1, pool_stride)))
        outs.append(pooled)

    out_w = num_filters * l_pooled
    if out_w_pad > out_w:                                  # lane-dense pad
        outs.append(jnp.zeros((tile_s, out_w_pad - out_w), jnp.float32))

    # Bias (per-filter constant, zero in pad columns) added post-pool; one
    # full-lane vadd + one unmasked full-tile store.
    o_ref[...] = (jnp.concatenate(outs, axis=-1) + bias_ref[...]).astype(o_ref.dtype)


def cnn_forward(x, weight, bias, *, kernel_size, num_filters, pool_size,
                kernel_stride=1, pool_stride=1):
    """x: (seq_len, input_size, 1) -> (seq_len, num_filters * L_pooled, 1)."""
    seq_len, input_size, _ = x.shape
    pad = kernel_size // 2
    l_conv = (input_size + 2 * pad - kernel_size) // kernel_stride + 1
    l_pooled = (l_conv - pool_size) // pool_stride + 1
    out_w = num_filters * l_pooled
    out_w_pad = _round_up(out_w, 128)                       # lane-dense output
    w_cols = num_filters * l_conv
    w_cols_pad = _round_up(w_cols, 128)                     # lane-dense matmul out

    # ---- banded weight matrix (built with static indices; tiny).
    F, J, K = num_filters, l_conv, kernel_size
    f_idx = np.repeat(np.arange(F), J * K)
    j_idx = np.tile(np.repeat(np.arange(J), K), F)
    k_idx = np.tile(np.arange(K), F * J)
    i_idx = j_idx * kernel_stride + k_idx - pad
    valid = (i_idx >= 0) & (i_idx < input_size)             # padding taps drop out
    rows = i_idx[valid]
    cols = (f_idx * l_conv + j_idx)[valid]
    vals = weight[:, 0, :].astype(jnp.float32)[f_idx[valid], k_idx[valid]]
    wband = jnp.zeros((input_size, w_cols_pad), jnp.float32).at[rows, cols].set(vals)

    # ---- bias row in pooled/flattened layout (zeros in the lane pad).
    bcols = np.arange(out_w)
    bias_row = jnp.zeros((1, out_w_pad), jnp.float32).at[0, bcols].set(
        bias.astype(jnp.float32)[bcols // l_pooled])

    # ---- row-tile seq_len (multiple of 8 sublanes; tiny VMEM footprint).
    x2 = x[:, :, 0].astype(jnp.float32)                     # (S, input_size)
    tile_s = min(512, _round_up(seq_len, 8))
    s_pad = _round_up(seq_len, tile_s)
    if s_pad != seq_len:
        x2 = jnp.pad(x2, ((0, s_pad - seq_len), (0, 0)))

    kernel = functools.partial(
        _cnn_kernel,
        l_conv=l_conv, l_pooled=l_pooled,
        pool_size=pool_size, pool_stride=pool_stride,
        num_filters=num_filters, out_w_pad=out_w_pad)

    out = pl.pallas_call(
        kernel,
        out_shape=jax.ShapeDtypeStruct((s_pad, out_w_pad), jnp.float32),
        grid=(s_pad // tile_s,),
        in_specs=[
            pl.BlockSpec((tile_s, input_size), lambda i: (i, 0)),     # x tile
            pl.BlockSpec((input_size, w_cols_pad), lambda i: (0, 0)), # W_band (resident)
            pl.BlockSpec((1, out_w_pad), lambda i: (0, 0)),           # bias row (resident)
        ],
        out_specs=pl.BlockSpec((tile_s, out_w_pad), lambda i: (i, 0)),
        compiler_params=pltpu.CompilerParams(
            dimension_semantics=("parallel",)),
    )(x2, wband, bias_row)

    # torch: flatten(start_dim=1) already done in-kernel; drop pads, unsqueeze(-1).
    return out[:seq_len, :out_w][..., None]


def _reference_forward(x, weight, bias, *, kernel_size, pool_size,
                       kernel_stride=1, pool_stride=1):
    """Independent pure-JAX reference mirroring torch Conv1d + MaxPool1d."""
    pad = kernel_size // 2
    x_ncw = jnp.transpose(x.astype(jnp.float32), (0, 2, 1))       # (S, 1, W)
    conv = lax.conv_general_dilated(
        x_ncw, weight.astype(jnp.float32),
        window_strides=(kernel_stride,), padding=[(pad, pad)],
        dimension_numbers=("NCH", "OIH", "NCH"))
    conv = conv + bias.astype(jnp.float32)[None, :, None]
    pooled = lax.reduce_window(
        conv, -jnp.inf, lax.max,
        window_dimensions=(1, 1, pool_size),
        window_strides=(1, 1, pool_stride),
        padding="VALID")
    return pooled.reshape(pooled.shape[0], -1)[..., None]


if __name__ == "__main__":
    # Module hyper-parameters (small, consistent with the forward semantics).
    seq_len = 8
    input_size = 16
    kernel_size = 3
    num_filters = 4
    pool_size = 2
    kernel_stride = 1
    pool_stride = 1

    key = jax.random.PRNGKey(0)
    kx, kw, kb = jax.random.split(key, 3)

    # Input: (seq_len, input_size, 1), like the PyTorch module expects.
    x = jax.random.normal(kx, (seq_len, input_size, 1), dtype=jnp.float32)

    # Deterministic "Conv1d" parameters: weight (F, 1, K), bias (F,)
    bound = 1.0 / (1 * kernel_size) ** 0.5
    weight = jax.random.uniform(kw, (num_filters, 1, kernel_size),
                                minval=-bound, maxval=bound, dtype=jnp.float32)
    bias = jax.random.uniform(kb, (num_filters,),
                              minval=-bound, maxval=bound, dtype=jnp.float32)

    out = cnn_forward(x, weight, bias,
                      kernel_size=kernel_size, num_filters=num_filters,
                      pool_size=pool_size, kernel_stride=kernel_stride,
                      pool_stride=pool_stride)
    out = jax.block_until_ready(out)

    ref = _reference_forward(x, weight, bias,
                             kernel_size=kernel_size, pool_size=pool_size,
                             kernel_stride=kernel_stride,
                             pool_stride=pool_stride)
    assert out.shape == ref.shape, (out.shape, ref.shape)
    assert jnp.allclose(out, ref, atol=1e-4, rtol=1e-4), float(
        jnp.max(jnp.abs(out - ref)))

    print("KERNEL_OK")
</pallas_src>

<mosaic_0001>
module attributes {stable_mosaic.version = 11 : i64} {
  func.func @_cnn_kernel(%arg0: i32, %arg1: memref<8x16xf32, #tpu.memory_space<vmem>>, %arg2: memref<16x128xf32, #tpu.memory_space<vmem>>, %arg3: memref<1x128xf32, #tpu.memory_space<vmem>>, %arg4: memref<8x128xf32, #tpu.memory_space<vmem>>) attributes {dimension_semantics = [#tpu.dimension_semantics<parallel>], iteration_bounds = array<i64: 1>, scalar_prefetch = 0 : i64, scratch_operands = 0 : i64, tpu.core_type = #tpu.core_type<tc>, window_params = [{transform_indices = @transform_0, window_bounds = array<i64: 8, 16>}, {pipeline_mode = #tpu.pipeline_mode<synchronous>, transform_indices = @transform_1, window_bounds = array<i64: 16, 128>}, {pipeline_mode = #tpu.pipeline_mode<synchronous>, transform_indices = @transform_2, window_bounds = array<i64: 1, 128>}, {transform_indices = @transform_3, window_bounds = array<i64: 8, 128>}]} {
    %c0 = arith.constant 0 : index
    %c0_0 = arith.constant 0 : index
    %0 = vector.load %arg1[%c0, %c0_0] : memref<8x16xf32, #tpu.memory_space<vmem>>, vector<8x16xf32>
    %c0_1 = arith.constant 0 : index
    %c0_2 = arith.constant 0 : index
    %1 = vector.load %arg2[%c0_1, %c0_2] : memref<16x128xf32, #tpu.memory_space<vmem>>, vector<16x128xf32>
    %cst = arith.constant dense<0.000000e+00> : vector<8x128xf32>
    %2 = tpu.matmul %0, %1, %cst {dimension_numbers = #tpu.dot_dimension_numbers<[1], [0], [0], [1], [0, 0, 1, 1], [], []>, precision = #tpu.contract_precision<fp32>} : vector<8x16xf32>, vector<16x128xf32>, vector<8x128xf32> -> vector<8x128xf32>
    %3 = vector.extract_strided_slice %2 {offsets = [0, 0], sizes = [8, 16], strides = [1, 1]} : vector<8x128xf32> to vector<8x16xf32>
    %4 = vector.extract_strided_slice %3 {offsets = [0, 0], sizes = [8, 15], strides = [1, 1]} : vector<8x16xf32> to vector<8x15xf32>
    %5 = vector.extract_strided_slice %3 {offsets = [0, 1], sizes = [8, 15], strides = [1, 1]} : vector<8x16xf32> to vector<8x15xf32>
    %6 = arith.maximumf %4, %5 : vector<8x15xf32>
    %7 = vector.extract_strided_slice %2 {offsets = [0, 16], sizes = [8, 16], strides = [1, 1]} : vector<8x128xf32> to vector<8x16xf32>
    %8 = vector.extract_strided_slice %7 {offsets = [0, 0], sizes = [8, 15], strides = [1, 1]} : vector<8x16xf32> to vector<8x15xf32>
    %9 = vector.extract_strided_slice %7 {offsets = [0, 1], sizes = [8, 15], strides = [1, 1]} : vector<8x16xf32> to vector<8x15xf32>
    %10 = arith.maximumf %8, %9 : vector<8x15xf32>
    %11 = vector.extract_strided_slice %2 {offsets = [0, 32], sizes = [8, 16], strides = [1, 1]} : vector<8x128xf32> to vector<8x16xf32>
    %12 = vector.extract_strided_slice %11 {offsets = [0, 0], sizes = [8, 15], strides = [1, 1]} : vector<8x16xf32> to vector<8x15xf32>
    %13 = vector.extract_strided_slice %11 {offsets = [0, 1], sizes = [8, 15], strides = [1, 1]} : vector<8x16xf32> to vector<8x15xf32>
    %14 = arith.maximumf %12, %13 : vector<8x15xf32>
    %15 = vector.extract_strided_slice %2 {offsets = [0, 48], sizes = [8, 16], strides = [1, 1]} : vector<8x128xf32> to vector<8x16xf32>
    %16 = vector.extract_strided_slice %15 {offsets = [0, 0], sizes = [8, 15], strides = [1, 1]} : vector<8x16xf32> to vector<8x15xf32>
    %17 = vector.extract_strided_slice %15 {offsets = [0, 1], sizes = [8, 15], strides = [1, 1]} : vector<8x16xf32> to vector<8x15xf32>
    %18 = arith.maximumf %16, %17 : vector<8x15xf32>
    %cst_3 = arith.constant 0.000000e+00 : f32
    %19 = vector.broadcast %cst_3 : f32 to vector<8x68xf32>
    %20 = tpu.concatenate %6, %10, %14, %18, %19 in 1 : vector<8x15xf32>, vector<8x15xf32>, vector<8x15xf32>, vector<8x15xf32>, vector<8x68xf32> -> vector<8x128xf32>
    %c0_4 = arith.constant 0 : index
    %c0_5 = arith.constant 0 : index
    %21 = vector.load %arg3[%c0_4, %c0_5] : memref<1x128xf32, #tpu.memory_space<vmem>>, vector<1x128xf32>
    %22 = vector.broadcast %21 : vector<1x128xf32> to vector<8x128xf32>
    %23 = arith.addf %20, %22 : vector<8x128xf32>
    %c0_6 = arith.constant 0 : index
    %c0_7 = arith.constant 0 : index
    %24 = vector.load %arg4[%c0_6, %c0_7] : memref<8x128xf32, #tpu.memory_space<vmem>>, vector<8x128xf32>
    tpu.vector_store %arg4[%c0_6, %c0_7], %23 {strides = array<i32>} : memref<8x128xf32, #tpu.memory_space<vmem>>, vector<8x128xf32>,
    return
  }
  func.func @transform_0(%arg0: i32) -> (i32, i32) {
    %c0_i32 = arith.constant 0 : i32
    %c0_i32_0 = arith.constant 0 : i32
    return %arg0, %c0_i32 : i32, i32
  }
  func.func @transform_1(%arg0: i32) -> (i32, i32) {
    %c0_i32 = arith.constant 0 : i32
    %c0_i32_0 = arith.constant 0 : i32
    %c0_i32_1 = arith.constant 0 : i32
    return %c0_i32, %c0_i32_0 : i32, i32
  }
  func.func @transform_2(%arg0: i32) -> (i32, i32) {
    %c0_i32 = arith.constant 0 : i32
    %c0_i32_0 = arith.constant 0 : i32
    %c0_i32_1 = arith.constant 0 : i32
    return %c0_i32, %c0_i32_0 : i32, i32
  }
  func.func @transform_3(%arg0: i32) -> (i32, i32) {
    %c0_i32 = arith.constant 0 : i32
    %c0_i32_0 = arith.constant 0 : i32
    return %arg0, %c0_i32 : i32, i32
  }
}

</mosaic_0001>

<bundles_post_ra>
// kernel: tpu_custom_call.1
= control target key start
LH: loop header
LB: loop body
LE: loop exit
PB: predicated region body
PF: predicated region fallthrough
CT: control target
= control target key end

     0   :  { %8 = vsyncpa [#allocation3], 0  ;;  %s809_s0 = inlined_call_operand.hbm [shape: f32[8,16], index: 0, kind: input, shape index: {}]   ;;  %s810_s1 = inlined_call_operand.hbm [shape: f32[16,128], index: 1, kind: input, shape index: {}]   ;;  %s811_s2 = inlined_call_operand.vmem [shape: f32[1,128], index: 2, kind: input, shape index: {}]   ;;  %s812_s3 = inlined_call_operand.hbm [shape: f32[8,128], index: 3, kind: output, shape index: {}]  }
   0x1   :  { %9 = vsyncpa [#allocation6], 0 }
   0x2   :  { %10 = vsyncpa [#allocation4], 0  ;;  %s726_s12 = smov [#allocation2]   ;;  %s727_s14 = smov [#allocation5]  }
   0x3   :  { %s17_s13 = sshll.u32 %s726_s12, 4  ;;  %s26_s15 = sshll.u32 %s727_s14, 4  ;;  %s18_s13 = int_to_ptr.vmem [resolvable:$true] %s17_s13  ;;  %s757_s15 = int_to_ptr.vmem [resolvable:$true] %s26_s15 }
   0x4   :  { %s654_s18 = scalar_lea.hbm %s809_s0, 128 }
   0x5   :  { %p655_p0 = scmp.ne.s32.totalorder %s809_s0, %s654_s18  ;;  %p658_p1 = scmp.lt.u32.totalorder %s654_s18, %s809_s0 }
   0x7   :  { %p660_p2 = pnand %p658_p1, %p655_p0 }
   0x9   :  { %663 = shalt.err (!%p660_p2)
}
   0xa   :  { %s664_s23 = scalar_lea.vmem %s18_s13, 128  ;;  %p669_p4 = scmp.lt.s32.totalorder %s18_s13, %s18_s13 }
   0xb   :  { %p665_p3 = scmp.ne.s32.totalorder %s18_s13, %s664_s23  ;;  %p670_p5 = scmp.lt.s32.totalorder %s664_s23, %s664_s23 }
   0xd   :  { %p671_p6 = por %p670_p5, %p669_p4 }
   0xf   :  { %p672_p7 = pnand %p671_p6, %p665_p3 }
  0x11   :  { %675 = shalt.err (!%p672_p7)
}
  0x12   :  { %20 = dma.hbm_to_vmem [thread:$0]  %s809_s0, 128, %s18_s13, [#allocation3]  }
  0x13   :  { %s676_s28 = scalar_lea.hbm %s810_s1, 256 }
  0x14   :  { %p677_p8 = scmp.ne.s32.totalorder %s810_s1, %s676_s28  ;;  %p680_p9 = scmp.lt.u32.totalorder %s676_s28, %s810_s1 }
  0x16   :  { %p682_p10 = pnand %p680_p9, %p677_p8 }
  0x18   :  { %685 = shalt.err (!%p682_p10)
}
  0x19   :  { %s686_s6 = scalar_lea.vmem %s757_s15, 256  ;;  %p691_p12 = scmp.lt.s32.totalorder %s757_s15, %s757_s15 }
  0x1a   :  { %p687_p11 = scmp.ne.s32.totalorder %s757_s15, %s686_s6  ;;  %p692_p13 = scmp.lt.s32.totalorder %s686_s6, %s686_s6 }
  0x1c   :  { %p693_p0 = por %p692_p13, %p691_p12 }
  0x1e   :  { %p694_p1 = pnand %p693_p0, %p687_p11 }
  0x20   :  { %697 = shalt.err (!%p694_p1)
}
  0x21   :  { %s728_s0 = smov 128   ;;  %s729_s7 = smov 8  }
  0x22   :  { %32 = dma.hbm_to_vmem [thread:$0]  %s810_s1, 256, %s757_s15, [#allocation6], %s728_s0, %s728_s0, %s729_s7  }
  0x23   :  { %720 = dma.done.wait [#allocation3], 128  }
  0x24   :  { %721 = vsyncadd [#allocation3], 4294967168 }
  0x25   :  { %722 = dma.done.wait [#allocation6], 256  }
  0x26   :  { %723 = vsyncadd [#allocation6], 4294967040  ;;  %v730_v0 = vmov 0.0|0.0   ;;  %vm731_vm0 = vmmov 0   ;;  %v732_v1 = vmov 0.0   ;;  %vm44_vm1 = vcmask 130048  }
  0x27   :  { %625 = vmatprep.subr.bf16.mxu0 %v730_v0  ;;  %599 = vmatprep.mubr.msk.f32.mxu0 %vm731_vm0, %v732_v1  ;;  %v42_v2 = vld [vmem:[#allocation5] sm:$0xff]  ;;  %v43_v3 = vld [vmem:[#allocation5 + $0x8] sm:$0xff]  ;;  %v41_v4 = vld [vmem:[#allocation2] sm:$0xff]  ;;  %s733_s1 = smov 127   ;;  %s734_s10 = smov 126   ;;  %vm522_vm2 = vcmask 121856  }
  0x28   :  { %616 = vmatprep.subr.bf16.mxu1 %v730_v0  ;;  %578 = vmatprep.mubr.msk.f32.mxu1 %vm731_vm0, %v732_v1  ;;  %v49_v5 = vand.u32 4294901760, %v42_v2  ;;  %v52_v6 = vand.u32 4294901760, %v43_v3  ;;  %v46_v7 = vsel %vm44_vm1, %v41_v4, 0  ;;  %s735_s11 = smov 125   ;;  %vm524_vm3 = vcmask 244736   ;;  %s736_s14 = smov [#allocation7]  }
  0x29   :  { %v115_v8 = vand.u32 4294901760, %v46_v7  ;;  %vm526_vm4 = vcmask 367616   ;;  %vm528_vm5 = vcmask 490496   ;;  %v555_v37 = vld [vmem:[%s811_s2] ss:$0 sm:$0xff]  ;;  %s545_s15 = sshll.u32 %s736_s14, 4  ;;  %s546_s15 = int_to_ptr.vmem [resolvable:$true] %s545_s15 }
  0x2a   :  { %v617_v9 = vpack.c.bf16 %v52_v6, %v49_v5  ;;  %v127_v10 = vsub.f32 %v42_v2, %v49_v5  ;;  %v134_v11 = vsub.f32 %v43_v3, %v52_v6  ;;  %s698_s16 = scalar_lea.vmem %s546_s15, 128  ;;  %p703_p3 = scmp.lt.s32.totalorder %s546_s15, %s546_s15 }
  0x2b   :  { %v116_v12 = vsub.f32 %v46_v7, %v115_v8  ;;  %p699_p2 = scmp.ne.s32.totalorder %s546_s15, %s698_s16  ;;  %p704_p4 = scmp.lt.s32.totalorder %s698_s16, %s698_s16 }
  0x2c   :  { %627 = vmatpush3.bf16.msra.mxu0 %v617_v9  ;;  %618 = vmatpush3.bf16.msra.mxu1 %v617_v9  ;;  %v128_v13 = vand.u32 4294901760, %v127_v10  ;;  %v135_v14 = vand.u32 4294901760, %v134_v11  ;;  %v623_v24 = vpack.c.bf16 %v134_v11, %v127_v10 }
  0x2d   :  { %v117_v15 = vand.u32 4294901760, %v116_v12  ;;  %619 = vmatprep.subr.bf16.mxu1 %v730_v0  ;;  %628 = vmatprep.subr.bf16.mxu0 %v730_v0  ;;  %p705_p5 = por %p704_p4, %p703_p3 }
  0x2e   :  { %v129_v16 = vsub.f32 %v127_v10, %v128_v13  ;;  %v136_v17 = vsub.f32 %v134_v11, %v135_v14  ;;  %v629_v18 = vpack.c.bf16 %v135_v14, %v128_v13 }
  0x2f   :  { %600 = vmatmul.mubr.f32.vlgmr.msra.gmra.mrb[0].mxu0 %v117_v15  ;;  %v118_v19 = vsub.f32 %v116_v12, %v117_v15  ;;  %p706_p6 = pnand %p705_p5, %p699_p2 }
  0x30   :  { %v130_v20 = vand.u32 4294901760, %v129_v16  ;;  %v137_v21 = vand.u32 4294901760, %v136_v17  ;;  %630 = vmatpush3.bf16.msra.mxu0 %v629_v18  ;;  %606 = vmatprep.mubr.msk.f32.mxu0 %vm731_vm0, %v732_v1 }
  0x31   :  { %v119_v22 = vand.u32 4294901760, %v118_v19  ;;  %631 = vmatprep.subr.bf16.mxu0 %v730_v0 }
  0x32   :  { %v620_v23 = vpack.c.bf16 %v137_v21, %v130_v20 }
  0x33   :  { %579 = vmatmul.mubr.f32.vlgmr.msra.gmra.mrb[0].mxu1 %v119_v22 }
  0x34   :  { %621 = vmatpush3.bf16.msra.mxu1 %v620_v23  ;;  %585 = vmatprep.mubr.msk.f32.mxu1 %vm731_vm0, %v732_v1 }
  0x35   :  { %622 = vmatprep.subr.bf16.mxu1 %v730_v0 }
  0x37   :  { %607 = vmatmul.mubr.f32.vlgmr.msra.gmra.mrb[0].mxu0 %v115_v8 }
  0x38   :  { %633 = vmatpush3.bf16.msra.mxu0 %v617_v9  ;;  %613 = vmatprep.mubr.msk.f32.mxu0 %vm731_vm0, %v732_v1 }
  0x3b   :  { %586 = vmatmul.mubr.f32.vlgmr.msra.gmra.mrb[0].mxu1 %v115_v8 }
  0x3c   :  { %624 = vmatpush3.bf16.msra.mxu1 %v623_v24  ;;  %592 = vmatprep.mubr.msk.f32.mxu1 %vm731_vm0, %v732_v1 }
  0x3f   :  { %614 = vmatmul.mubr.f32.vlgmr.msra.gmra.mrb[0].mxu0 %v115_v8 }
  0x43   :  { %593 = vmatmul.mubr.f32.vlgmr.msra.gmra.mrb[0].mxu1 %v116_v12 }
 0x112   :  { %v503_v25 = vpop.f32.mrb[0].mxu0 }
 0x113   :  { %v615_v26 = vpop.f32.mrb[1].mxu0 }
 0x116   :  { %v278_v27 = vpop.f32.mrb[0].mxu1 }
 0x117   :  { %v634_v28 = vadd.f32 %v503_v25, %v278_v27  ;;  %v594_v29 = vpop.f32.mrb[1].mxu1 }
 0x119   :  { %508 = vrot.lane.b32.xlu0 %v634_v28, %s733_s1 }
 0x18b   :  { %v509_v30 = vpop.permute.xlu0 %508 }
 0x18c   :  { %v511_v31 = vmax.f32 %v634_v28, %v509_v30 }
 0x18e   :  { %516 = vrot.lane.b32.xlu1 %v511_v31, %s734_s10  ;;  %513 = vrot.lane.b32.xlu0 %v511_v31, %s733_s1 }
 0x192   :  { %519 = vrot.lane.b32.xlu1 %v511_v31, %s735_s11 }
 0x200   :  { %v517_v32 = vpop.permute.xlu1 %516  ;;  %v514_v33 = vpop.permute.xlu0 %513 }
 0x201   :  { %v523_v34 = vsel %vm522_vm2, %v511_v31, %v514_v33 }
 0x202   :  { %v525_v36 = vsel %vm524_vm3, %v523_v34, %v517_v32 }
 0x204   :  { %v520_v35 = vpop.permute.xlu1 %519 }
 0x205   :  { %v527_v38 = vsel %vm526_vm4, %v525_v36, %v520_v35 }
 0x206   :  { %v529_v39 = vsel %vm528_vm5, %v527_v38, 0.0 }
 0x207   :  { %v537_v40 = vadd.f32 %v555_v37, %v529_v39 }
 0x209   :  { %538 = vst [vmem:[#allocation7] sm:$0xff] %v537_v40 }
 0x20a   :  { %709 = shalt.err (!%p706_p6)
}
 0x20b   :  { %s710_s19 = scalar_lea.hbm %s812_s3, 128 }
 0x20c   :  { %p711_p7 = scmp.ne.s32.totalorder %s812_s3, %s710_s19  ;;  %p714_p8 = scmp.lt.u32.totalorder %s710_s19, %s812_s3 }
 0x20e   :  { %p716_p9 = pnand %p714_p8, %p711_p7 }
 0x210   :  { %719 = shalt.err (!%p716_p9)
}
 0x211   :  { %548 = dma.vmem_to_hbm [thread:$0]  %s546_s15, 128, %s812_s3, [#allocation4]  }
 0x212   :  { %724 = dma.done.wait [#allocation4], 128  }
 0x213   :  { %725 = vsyncadd [#allocation4], 4294967168 }
 0x214   :  { %552 = vsyncpa [#allocation3], 1 }
 0x215   :  { %553 = vsyncpa [#allocation6], 1 }
 0x216   :  { %554 = vsyncpa [#allocation4], 1 }

</bundles_post_ra>
